<compile_context>
chip_gen: v5e
topology: v5e:2x2
jax: 0.10.0
libtpu: 0.0.40
codegen_flags: <defaults>
</compile_context>

<pallas_src>
import math
from functools import partial

import jax
import jax.numpy as jnp
from jax.experimental import pallas as pl
from jax.experimental.pallas import tpu as pltpu

LANE = 128


def _round_up(x, m):
    return (x + m - 1) // m * m


def _sublane(dtype):
    # sublane packing: 4-byte -> 8, 2-byte -> 16, 1-byte -> 32
    return 8 * (4 // jnp.dtype(dtype).itemsize)


def _tcs_kernel(x_main_ref, x_halo_ref, wf_ref, o_ref, cols_ref, *, K, C_pad, T_tile):
    # x_main_ref: (C_pad, T_tile)      input columns of this time tile
    # x_halo_ref: (C_pad, HALO)        lookahead columns from the next tile
    # wf_ref:     (F_pad, K * C_pad)   fused depthwise*pointwise weight (grid-invariant)
    # o_ref:      (F_pad, T_tile)      lane-dense output tile
    # cols_ref:   (K * C_pad, T_tile)  im2col scratch (VMEM)
    if K > 1:
        x_cat = jnp.concatenate([x_main_ref[...], x_halo_ref[...]], axis=1)
    else:
        x_cat = x_main_ref[...]
    W = x_cat.shape[1]

    # Build the im2col stack one tap at a time: lane rotation (XLU) + aligned
    # store, so only a single shifted copy is ever live.
    for j in range(K):
        shifted = x_cat if j == 0 else pltpu.roll(x_cat, shift=W - j, axis=1)
        cols_ref[j * C_pad:(j + 1) * C_pad, :] = shifted[:, :T_tile]

    # One fused MXU matmul; operands in the input dtype, f32 accumulation.
    y = jnp.dot(wf_ref[...], cols_ref[...], preferred_element_type=jnp.float32)
    o_ref[...] = y.astype(o_ref.dtype)


def tcs_conv1d(x, w_depthwise, w_pointwise, kernel_size, *, t_tile=512):
    """x: (N, C, T); w_depthwise: (C, 1, K); w_pointwise: (F, C, 1) -> (N, F, T_out)."""
    N, C, T = x.shape
    K = int(kernel_size)
    F = w_pointwise.shape[0]

    # Pad_Conv "same-ish" padding + output length (matches the PyTorch module).
    left = max(math.floor(K / 2) - 1, 0)
    right = max(math.floor(K / 2), 0)
    T_out = T + left + right - K + 1

    sub = _sublane(x.dtype)
    C_pad = _round_up(C, sub)
    F_pad = _round_up(F, sub)

    # Lane-aligned lookahead (>= K-1 columns) and time-tile sizing.
    HALO = max(_round_up(K - 1, LANE), LANE)
    T_tile = max(min(int(t_tile), _round_up(T_out, LANE)), HALO)
    T_tile = _round_up(T_tile, HALO)
    T_out_p = _round_up(T_out, T_tile)
    n_t = T_out_p // T_tile
    T_in_p = T_out_p + HALO
    halo_stride = T_tile // HALO

    # Single pad op: channel pad to C_pad, Pad_Conv left pad, alignment tail.
    x_pad = jnp.pad(x, ((0, 0), (0, C_pad - C), (left, T_in_p - T - left)))

    # Fused weight: Wf[f, j*C_pad + c] = w_pointwise[f, c] * w_depthwise[c, j]
    wdw = jnp.pad(w_depthwise[:, 0, :], ((0, C_pad - C), (0, 0)))           # (C_pad, K)
    wpw = jnp.pad(w_pointwise[:, :, 0], ((0, F_pad - F), (0, C_pad - C)))   # (F_pad, C_pad)
    w_fused = jnp.einsum('fc,cj->fjc', wpw, wdw).reshape(F_pad, K * C_pad)
    w_fused = w_fused.astype(x.dtype)

    kernel = partial(_tcs_kernel, K=K, C_pad=C_pad, T_tile=T_tile)

    # VMEM budget (double-buffered inputs/outputs + weight + scratch), capped for
    # v7x's 64 MiB physical VMEM.
    itemsize = jnp.dtype(x.dtype).itemsize
    vmem_est = (2 * C_pad * (T_tile + HALO)
                + 2 * F_pad * T_tile
                + F_pad * K * C_pad
                + K * C_pad * T_tile) * itemsize
    vmem_est += F_pad * T_tile * 4  # f32 matmul result
    vmem_limit = int(min(max(2 * vmem_est, 16 * 1024 * 1024), 48 * 1024 * 1024))

    out_full = pl.pallas_call(
        kernel,
        out_shape=jax.ShapeDtypeStruct((N, F_pad, T_out_p), x.dtype),
        grid_spec=pltpu.PrefetchScalarGridSpec(
            num_scalar_prefetch=0,
            grid=(N, n_t),
            in_specs=[
                # main time tile of the padded input
                pl.BlockSpec((pl.Squeezed(), C_pad, T_tile),
                             lambda b, t: (b, 0, t)),
                # lookahead (halo) columns: first HALO columns of the next tile
                pl.BlockSpec((pl.Squeezed(), C_pad, HALO),
                             lambda b, t: (b, 0, (t + 1) * halo_stride)),
                # grid-invariant fused weight: stays VMEM-resident across steps
                pl.BlockSpec((F_pad, K * C_pad), lambda b, t: (0, 0)),
            ],
            out_specs=pl.BlockSpec((pl.Squeezed(), F_pad, T_tile),
                                   lambda b, t: (b, 0, t)),
            scratch_shapes=[pltpu.VMEM((K * C_pad, T_tile), x.dtype)],
        ),
        compiler_params=pltpu.CompilerParams(
            dimension_semantics=("parallel", "parallel"),
            vmem_limit_bytes=vmem_limit),
    )(x_pad, x_pad, w_fused)

    return out_full[:, :F, :T_out]


def tcs_conv1d_ref(x, w_depthwise, w_pointwise, kernel_size):
    """Plain-JAX reference matching PyTorch semantics (for verification)."""
    K = kernel_size
    left = max(math.floor(K / 2) - 1, 0)
    right = max(math.floor(K / 2), 0)
    x_pad = jnp.pad(x, ((0, 0), (0, 0), (left, right)))
    C = x.shape[1]
    y = jax.lax.conv_general_dilated(
        x_pad, w_depthwise, window_strides=(1,), padding="VALID",
        dimension_numbers=("NCH", "OIH", "NCH"), feature_group_count=C)
    z = jax.lax.conv_general_dilated(
        y, w_pointwise, window_strides=(1,), padding="VALID",
        dimension_numbers=("NCH", "OIH", "NCH"))
    return z


def _run_case(key, N, C, T, F, K):
    kx, kdw, kpw = jax.random.split(key, 3)
    x = jax.random.normal(kx, (N, C, T), dtype=jnp.float32)
    w_depthwise = jax.random.normal(kdw, (C, 1, K), dtype=jnp.float32) * 0.1
    w_pointwise = jax.random.normal(kpw, (F, C, 1), dtype=jnp.float32) * 0.1

    out = tcs_conv1d(x, w_depthwise, w_pointwise, K)
    out = jax.block_until_ready(out)

    ref = tcs_conv1d_ref(x, w_depthwise, w_pointwise, K)
    assert out.shape == ref.shape, (out.shape, ref.shape)
    assert jnp.allclose(out, ref, atol=1e-5, rtol=1e-5), "mismatch vs reference"


if __name__ == "__main__":
    key = jax.random.PRNGKey(0)
    k1, k2 = jax.random.split(key)

    # "Mother" hyperparameters at depth=0: nb_channels=4, nb_features=8, kernel_size=8
    _run_case(k1, N=2, C=4, T=16, F=8, K=8)

    # Multi-time-tile path (halo across tile boundary), odd K, non-aligned C/F.
    _run_case(k2, N=1, C=3, T=600, F=5, K=5)

    print("KERNEL_OK")
</pallas_src>

<mosaic_0001>
module attributes {stable_mosaic.version = 11 : i64} {
  func.func @_tcs_kernel(%arg0: i32, %arg1: i32, %arg2: memref<1x8x128xf32, #tpu.memory_space<vmem>>, %arg3: memref<1x8x128xf32, #tpu.memory_space<vmem>>, %arg4: memref<8x64xf32, #tpu.memory_space<vmem>>, %arg5: memref<1x8x128xf32, #tpu.memory_space<vmem>>, %arg6: memref<64x128xf32, #tpu.memory_space<vmem>>) attributes {dimension_semantics = [#tpu.dimension_semantics<parallel>, #tpu.dimension_semantics<parallel>], iteration_bounds = array<i64: 2, 1>, scalar_prefetch = 0 : i64, scratch_operands = 1 : i64, tpu.core_type = #tpu.core_type<tc>, window_params = [{transform_indices = @transform_0, window_bounds = array<i64: 1, 8, 128>}, {transform_indices = @transform_1, window_bounds = array<i64: 1, 8, 128>}, {pipeline_mode = #tpu.pipeline_mode<synchronous>, transform_indices = @transform_2, window_bounds = array<i64: 8, 64>}, {transform_indices = @transform_3, window_bounds = array<i64: 1, 8, 128>}]} {
    %c0 = arith.constant 0 : index
    %c0_0 = arith.constant 0 : index
    %c0_1 = arith.constant 0 : index
    %0 = vector.load %arg2[%c0, %c0_0, %c0_1] : memref<1x8x128xf32, #tpu.memory_space<vmem>>, vector<1x8x128xf32>
    %1 = vector.shape_cast %0 : vector<1x8x128xf32> to vector<8x128xf32>
    %c0_2 = arith.constant 0 : index
    %c0_3 = arith.constant 0 : index
    %c0_4 = arith.constant 0 : index
    %2 = vector.load %arg3[%c0_2, %c0_3, %c0_4] : memref<1x8x128xf32, #tpu.memory_space<vmem>>, vector<1x8x128xf32>
    %3 = vector.shape_cast %2 : vector<1x8x128xf32> to vector<8x128xf32>
    %4 = tpu.concatenate %1, %3 in 1 : vector<8x128xf32>, vector<8x128xf32> -> vector<8x256xf32>
    %5 = vector.extract_strided_slice %4 {offsets = [0, 0], sizes = [8, 128], strides = [1, 1]} : vector<8x256xf32> to vector<8x128xf32>
    %c0_5 = arith.constant 0 : index
    %c0_6 = arith.constant 0 : index
    %6 = vector.load %arg6[%c0_5, %c0_6] : memref<64x128xf32, #tpu.memory_space<vmem>>, vector<8x128xf32>
    tpu.vector_store %arg6[%c0_5, %c0_6], %5 {strides = array<i32>} : memref<64x128xf32, #tpu.memory_space<vmem>>, vector<8x128xf32>,
    %c255_i32 = arith.constant 255 : i32
    %7 = tpu.dynamic_rotate %4 by %c255_i32 dim 1 : vector<8x256xf32>, i32 -> vector<8x256xf32>
    %8 = vector.extract_strided_slice %7 {offsets = [0, 0], sizes = [8, 128], strides = [1, 1]} : vector<8x256xf32> to vector<8x128xf32>
    %c8 = arith.constant 8 : index
    %c0_7 = arith.constant 0 : index
    %9 = vector.load %arg6[%c8, %c0_7] : memref<64x128xf32, #tpu.memory_space<vmem>>, vector<8x128xf32>
    tpu.vector_store %arg6[%c8, %c0_7], %8 {strides = array<i32>} : memref<64x128xf32, #tpu.memory_space<vmem>>, vector<8x128xf32>,
    %c254_i32 = arith.constant 254 : i32
    %10 = tpu.dynamic_rotate %4 by %c254_i32 dim 1 : vector<8x256xf32>, i32 -> vector<8x256xf32>
    %11 = vector.extract_strided_slice %10 {offsets = [0, 0], sizes = [8, 128], strides = [1, 1]} : vector<8x256xf32> to vector<8x128xf32>
    %c16 = arith.constant 16 : index
    %c0_8 = arith.constant 0 : index
    %12 = vector.load %arg6[%c16, %c0_8] : memref<64x128xf32, #tpu.memory_space<vmem>>, vector<8x128xf32>
    tpu.vector_store %arg6[%c16, %c0_8], %11 {strides = array<i32>} : memref<64x128xf32, #tpu.memory_space<vmem>>, vector<8x128xf32>,
    %c253_i32 = arith.constant 253 : i32
    %13 = tpu.dynamic_rotate %4 by %c253_i32 dim 1 : vector<8x256xf32>, i32 -> vector<8x256xf32>
    %14 = vector.extract_strided_slice %13 {offsets = [0, 0], sizes = [8, 128], strides = [1, 1]} : vector<8x256xf32> to vector<8x128xf32>
    %c24 = arith.constant 24 : index
    %c0_9 = arith.constant 0 : index
    %15 = vector.load %arg6[%c24, %c0_9] : memref<64x128xf32, #tpu.memory_space<vmem>>, vector<8x128xf32>
    tpu.vector_store %arg6[%c24, %c0_9], %14 {strides = array<i32>} : memref<64x128xf32, #tpu.memory_space<vmem>>, vector<8x128xf32>,
    %c252_i32 = arith.constant 252 : i32
    %16 = tpu.dynamic_rotate %4 by %c252_i32 dim 1 : vector<8x256xf32>, i32 -> vector<8x256xf32>
    %17 = vector.extract_strided_slice %16 {offsets = [0, 0], sizes = [8, 128], strides = [1, 1]} : vector<8x256xf32> to vector<8x128xf32>
    %c32 = arith.constant 32 : index
    %c0_10 = arith.constant 0 : index
    %18 = vector.load %arg6[%c32, %c0_10] : memref<64x128xf32, #tpu.memory_space<vmem>>, vector<8x128xf32>
    tpu.vector_store %arg6[%c32, %c0_10], %17 {strides = array<i32>} : memref<64x128xf32, #tpu.memory_space<vmem>>, vector<8x128xf32>,
    %c251_i32 = arith.constant 251 : i32
    %19 = tpu.dynamic_rotate %4 by %c251_i32 dim 1 : vector<8x256xf32>, i32 -> vector<8x256xf32>
    %20 = vector.extract_strided_slice %19 {offsets = [0, 0], sizes = [8, 128], strides = [1, 1]} : vector<8x256xf32> to vector<8x128xf32>
    %c40 = arith.constant 40 : index
    %c0_11 = arith.constant 0 : index
    %21 = vector.load %arg6[%c40, %c0_11] : memref<64x128xf32, #tpu.memory_space<vmem>>, vector<8x128xf32>
    tpu.vector_store %arg6[%c40, %c0_11], %20 {strides = array<i32>} : memref<64x128xf32, #tpu.memory_space<vmem>>, vector<8x128xf32>,
    %c250_i32 = arith.constant 250 : i32
    %22 = tpu.dynamic_rotate %4 by %c250_i32 dim 1 : vector<8x256xf32>, i32 -> vector<8x256xf32>
    %23 = vector.extract_strided_slice %22 {offsets = [0, 0], sizes = [8, 128], strides = [1, 1]} : vector<8x256xf32> to vector<8x128xf32>
    %c48 = arith.constant 48 : index
    %c0_12 = arith.constant 0 : index
    %24 = vector.load %arg6[%c48, %c0_12] : memref<64x128xf32, #tpu.memory_space<vmem>>, vector<8x128xf32>
    tpu.vector_store %arg6[%c48, %c0_12], %23 {strides = array<i32>} : memref<64x128xf32, #tpu.memory_space<vmem>>, vector<8x128xf32>,
    %c249_i32 = arith.constant 249 : i32
    %25 = tpu.dynamic_rotate %4 by %c249_i32 dim 1 : vector<8x256xf32>, i32 -> vector<8x256xf32>
    %26 = vector.extract_strided_slice %25 {offsets = [0, 0], sizes = [8, 128], strides = [1, 1]} : vector<8x256xf32> to vector<8x128xf32>
    %c56 = arith.constant 56 : index
    %c0_13 = arith.constant 0 : index
    %27 = vector.load %arg6[%c56, %c0_13] : memref<64x128xf32, #tpu.memory_space<vmem>>, vector<8x128xf32>
    tpu.vector_store %arg6[%c56, %c0_13], %26 {strides = array<i32>} : memref<64x128xf32, #tpu.memory_space<vmem>>, vector<8x128xf32>,
    %c0_14 = arith.constant 0 : index
    %c0_15 = arith.constant 0 : index
    %28 = vector.load %arg4[%c0_14, %c0_15] : memref<8x64xf32, #tpu.memory_space<vmem>>, vector<8x64xf32>
    %c0_16 = arith.constant 0 : index
    %c0_17 = arith.constant 0 : index
    %29 = vector.load %arg6[%c0_16, %c0_17] : memref<64x128xf32, #tpu.memory_space<vmem>>, vector<64x128xf32>
    %cst = arith.constant dense<0.000000e+00> : vector<8x128xf32>
    %30 = tpu.matmul %28, %29, %cst {dimension_numbers = #tpu.dot_dimension_numbers<[1], [0], [0], [1], [0, 0, 1, 1], [], []>} : vector<8x64xf32>, vector<64x128xf32>, vector<8x128xf32> -> vector<8x128xf32>
    %c0_18 = arith.constant 0 : index
    %c0_19 = arith.constant 0 : index
    %c0_20 = arith.constant 0 : index
    %31 = vector.load %arg5[%c0_18, %c0_19, %c0_20] : memref<1x8x128xf32, #tpu.memory_space<vmem>>, vector<1x8x128xf32>
    %32 = vector.shape_cast %31 : vector<1x8x128xf32> to vector<8x128xf32>
    %33 = vector.shape_cast %30 : vector<8x128xf32> to vector<1x8x128xf32>
    tpu.vector_store %arg5[%c0_18, %c0_19, %c0_20], %33 {strides = array<i32>} : memref<1x8x128xf32, #tpu.memory_space<vmem>>, vector<1x8x128xf32>,
    return
  }
  func.func @transform_0(%arg0: i32, %arg1: i32) -> (i32, i32, i32) {
    %c0_i32 = arith.constant 0 : i32
    %c0_i32_0 = arith.constant 0 : i32
    return %arg0, %c0_i32, %arg1 : i32, i32, i32
  }
  func.func @transform_1(%arg0: i32, %arg1: i32) -> (i32, i32, i32) {
    %c1_i32 = arith.constant 1 : i32
    %0 = arith.addi %arg1, %c1_i32 : i32
    %c1_i32_0 = arith.constant 1 : i32
    %1 = arith.muli %0, %c1_i32_0 : i32
    %c0_i32 = arith.constant 0 : i32
    %c0_i32_1 = arith.constant 0 : i32
    return %arg0, %c0_i32, %1 : i32, i32, i32
  }
  func.func @transform_2(%arg0: i32, %arg1: i32) -> (i32, i32) {
    %c0_i32 = arith.constant 0 : i32
    %c0_i32_0 = arith.constant 0 : i32
    %c0_i32_1 = arith.constant 0 : i32
    return %c0_i32, %c0_i32_0 : i32, i32
  }
  func.func @transform_3(%arg0: i32, %arg1: i32) -> (i32, i32, i32) {
    %c0_i32 = arith.constant 0 : i32
    %c0_i32_0 = arith.constant 0 : i32
    return %arg0, %c0_i32, %arg1 : i32, i32, i32
  }
}

</mosaic_0001>

<bundles_post_ra>
// kernel: tpu_custom_call.1
= control target key start
LH: loop header
LB: loop body
LE: loop exit
PB: predicated region body
PF: predicated region fallthrough
CT: control target
= control target key end

     0   :  { %s1000_s0 = inlined_call_operand.hbm [shape: f32[2,8,256], index: 0, kind: input, shape index: {}]   ;;  %s1001_s1 = inlined_call_operand.hbm [shape: f32[2,8,256], index: 1, kind: input, shape index: {}]   ;;  %s1002_s2 = inlined_call_operand.hbm [shape: f32[8,64], index: 2, kind: input, shape index: {}]   ;;  %s1003_s3 = inlined_call_operand.hbm [shape: f32[2,8,128], index: 3, kind: output, shape index: {}]  }
   0x1   :  { %1007 = sst [smem:[#allocation18_spill]] %s1002_s2 }
   0x2   :  { %8 = vsyncpa [#allocation4], 0 }
   0x3   :  { %10 = vsyncpa [#allocation4 + $0x1], 0 }
   0x4   :  { %11 = vsyncpa [#allocation7], 0 }
   0x5   :  { %13 = vsyncpa [#allocation7 + $0x1], 0 }
   0x6   :  { %14 = vsyncpa [#allocation5], 0 }
   0x7   :  { %16 = vsyncpa [#allocation5 + $0x1], 0  ;;  %s841_s12 = smov 0   ;;  %s843_s13 = smov 0  }
   0x8   :  { %s845_s14 = smov 0   ;;  %s847_s15 = smov 0  }
   0x9   :  { %s849_s16 = smov 0   ;;  %s851_s17 = smov 0  }
   0xa LB: > { %1008 = sst [smem:[#allocation14_spill]] %s799_s14  ;;  %s872_s18 = sadd.s32 4294967295, %s811_s17   ;;  %s811_s17 = sphi %s851_s17, %s22_s17   ;;  %s807_s16 = sphi %s849_s16, %s1021_s16   ;;  %s803_s15 = sphi %s847_s15, %s1020_s15   ;;  %s799_s14 = sphi %s845_s14, %s1019_s14   ;;  %s795_s13 = sphi %s843_s13, %s1023_s13   ;;  %s791_s12 = sphi %s841_s12, %s1022_s12  }
   0xb   : > { %1009 = sst [smem:[#allocation15_spill]] %s807_s16  ;;  %s489_s19 = sadd.s32 4294967294, %s811_s17  }
   0xc   : > { %p56_p0 = scmp.ne.s32.totalorder %s795_s13, %s791_s12  ;;  %p57_p1 = scmp.eq.s32.totalorder %s872_s18, 0 }
   0xd   : > { %p133_p2 = scmp.eq.s32.totalorder %s872_s18, 1  ;;  %p139_p3 = scmp.eq.s32.totalorder %s489_s19, 1 }
   0xe   : > { %p881_p4 = por %p57_p1, %p56_p0  ;;  %p490_p5 = scmp.ge.s32.totalorder %s811_s17, 1 }
   0xf   : > { %p886_p6 = por %p139_p3, %p56_p0  ;;  %p146_p7 = scmp.lt.s32.totalorder %s811_s17, 3 }
  0x10   : > { %s1012_s2 = sld [smem:[#allocation18_spill]]  ;;  %p492_p9 = scmp.ge.s32.totalorder %s811_s17, 2 }
  0x11   : > { %p894_p8 = pnand %p490_p5, %p146_p7  ;;  %s813_s26 = smov [#allocation8]  }
  0x12   : > { %s160_s27 = sshll.u32 %s813_s26, 4  ;;  %s34_s28 = sadd.s32 1, %s807_s16  ;;  %s161_s27 = int_to_ptr.vmem [resolvable:$true] %s160_s27 }
  0x13   : > { %p521_p10 = pneg %p894_p8  ;;  %p36_p12 = scmp.ge.s32.totalorder %s34_s28, 2 }
  0x14   : > { %s43_s29 = sadd.s32 1, %s799_s14  ;;  %p50_p13 = scmp.ne.s32.totalorder %s799_s14, %s795_s13 }
  0x15   : > { %p522_p11 = pnand %p521_p10, %p57_p1  ;;  %p51_p0 = scmp.eq.s32.totalorder %s811_s17, 0 }
  0x16   : > { %s158_s24 = sshll.u32 %s1012_s2, 4  ;;  %s1025_s28 = smov (%p36_p12, %s34_s28), 0  ;;  %s159_s24 = int_to_ptr.hbm [resolvable:$true] %s158_s24 }
  0x17   : > { %524 = dma.hbm_to_vmem [thread:$0]  (!%p522_p11), %s159_s24, 128, %s161_s27, [#allocation7]  }
  0x18   : > { %1014 = sst [smem:[#allocation16_spill]] %s1025_s28  ;;  %p910_p3 = por %p51_p0, %p50_p13 }
  0x19   : > { %p916_p5 = por %p133_p2, %p50_p13  ;;  %s38_s5 = ssub.s32 %s807_s16, %s1025_s28 }
  0x1a   : > { %p537_p7 = scmp.lt.s32.totalorder %s811_s17, 2  ;;  %p41_p10 = scmp.eq.s32.totalorder %s38_s5, 0 }
  0x1b   : > { %s171_s6 = sand.u32 1, %s799_s14   ;;  %s509_s9 = sshll.u32 %s807_s16, 4 }
  0x1c   : > { %s493_s7 = sshll.u32 %s171_s6, 3  ;;  %s181_s19 = scalar_lea.hbm %s1000_s0, %s509_s9 }
  0x1d   : > { %s925_s8 = scalar_select %p41_p10, %s799_s14, %s43_s29  }
  0x1e   : > { %s175_s22 = scalar_lea.vmem [#allocation3], %s493_s7  ;;  %s183_s24 = sshll.u32 %s181_s19, 4  ;;  %s184_s24 = int_to_ptr.hbm [resolvable:$true] %s183_s24 }
  0x1f   : > { %1017 = sst [smem:[#allocation17_spill]] %s925_s8  ;;  %s185_s23 = sshll.u32 %s175_s22, 4  ;;  %s186_s23 = int_to_ptr.vmem [resolvable:$true] %s185_s23 }
  0x20   : > { %p526_p2 = pnand %p537_p7, %p910_p3  ;;  %s412_s5 = scalar_lea.hbm %s1001_s1, %s509_s9 }
  0x21   : > { %s192_s2 = sand.u32 1, %s811_s17   ;;  %s172_s28 = scalar_lea.sflag [#allocation4], %s171_s6 }
  0x22   : > { %528 = dma.hbm_to_vmem [thread:$0]  (!%p526_p2), %s184_s24, 128, %s186_s23, %s172_s28  }
  0x23   : > { %s413_s29 = scalar_lea.hbm %s412_s5, 8  ;;  %s196_s8 = scalar_lea.vmem [#allocation6], %s493_s7 }
  0x24   : > { %s205_s16 = sshll.u32 %s413_s29, 4  ;;  %s207_s14 = sshll.u32 %s196_s8, 4  ;;  %s206_s16 = int_to_ptr.hbm [resolvable:$true] %s205_s16  ;;  %s208_s14 = int_to_ptr.vmem [resolvable:$true] %s207_s14 }
  0x25   : > { %s193_s10 = scalar_lea.sflag [#allocation7], %s192_s2  ;;  %216 = sbr.rel (%p894_p8) target bundleno = 319 (0x13f), region = 32 }
  0x26   : > { %531 = dma.hbm_to_vmem [thread:$0]  (!%p526_p2), %s206_s16, 128, %s208_s14, %s193_s10  }
  0x27   : > { %s940_s30 = sand.u32 (!%p894_p8), 1, %s795_s13  }
  0x28   : > { %s943_s9 = sshll.u32 (!%p894_p8), %s940_s30, 3  ;;  %s219_s28 = scalar_lea.sflag (!%p894_p8), [#allocation4], %s940_s30 }
  0x29   : > { %s222_s6 = scalar_lea.vmem (!%p894_p8), [#allocation3], %s943_s9 }
  0x2a   : > { %774 = dma.done.wait (%p881_p4), %s219_s28, 128  }
  0x2b   : > { %776 = vsyncadd (%p881_p4), %s219_s28, 4294967168  ;;  %s228_s2 = sand.u32 1, %s872_s18   ;;  %s232_s16 = scalar_lea.vmem [#allocation6], %s943_s9 }
  0x2c   : > { %s229_s14 = scalar_lea.sflag [#allocation7], %s228_s2 }
  0x2d   : > { %778 = dma.done.wait (%p881_p4), %s229_s14, 128  }
  0x2e   : > { %780 = vsyncadd (%p881_p4), %s229_s14, 4294967168 }
  0x2f   : > { %782 = dma.done.wait (%p57_p1), [#allocation7], 128  }
  0x30   : > { %784 = vsyncadd (%p57_p1), [#allocation7], 4294967168  ;;  %v267_v0 = vld [vmem:[%s222_s6] sm:$0xff]  ;;  %v268_v1 = vld [vmem:[%s232_s16] sm:$0xff]  ;;  %s814_s25 = smov 121   ;;  %s815_s7 = smov 123   ;;  %v274_v3 = vlaneseq }
  0x31   : > { %v596_v2 = vpack.i.bf16 %v268_v1, %v267_v0  ;;  %s816_s8 = smov 125   ;;  %s817_s11 = smov 122   ;;  %v321_v33 = vld [vmem:[#allocation8] sm:$0xff]  ;;  %vm330_vm7 = vcmask 523264  }
  0x32   : > { %s818_s19 = smov 124   ;;  %s819_s20 = smov 126   ;;  %v275_v4 = vand.u32 127, %v274_v3 }
  0x33   : > { %597 = vrot.lane.b32.xlu0 %v596_v2, %s814_s25  ;;  %607 = vrot.lane.b32.xlu1 %v596_v2, %s815_s7  ;;  %s820_s22 = smov 127   ;;  %s506_s18 = sshll.u32 %s803_s15, 3 }
  0x34   : > { %617 = vrot.lane.b32.xlu2 %v596_v2, %s816_s8  ;;  %vm318_vm0 = vcmp.lt.s32.totalorder %v275_v4, 121  ;;  %vm311_vm1 = vcmp.lt.s32.totalorder %v275_v4, 122  ;;  %vm304_vm2 = vcmp.lt.s32.totalorder %v275_v4, 123  ;;  %vm297_vm3 = vcmp.lt.s32.totalorder %v275_v4, 124  ;;  %s367_s26 = scalar_lea.hbm %s1003_s3, %s506_s18  ;;  %s265_s27 = scalar_lea.vmem [#allocation9], %s943_s9 }
  0x35   : > { %vm290_vm4 = vcmp.lt.s32.totalorder %v275_v4, 125  ;;  %vm283_vm5 = vcmp.lt.s32.totalorder %v275_v4, 126  ;;  %vm276_vm6 = vcmp.lt.s32.totalorder %v275_v4, 127  ;;  %s369_s5 = sshll.u32 %s265_s27, 4  ;;  %s371_s29 = sshll.u32 %s367_s26, 4  ;;  %s370_s5 = int_to_ptr.vmem [resolvable:$true] %s369_s5  ;;  %s372_s29 = int_to_ptr.hbm [resolvable:$true] %s371_s29 }
  0x36   : > { %s356_s10 = scalar_lea.sflag [#allocation5], %s940_s30  ;;  %s735_s28 = sshra.s32 %s372_s29, 4  ;;  %s736_s28 = int_to_ptr.hbm [resolvable:$true] %s735_s28 }
  0x37   : > { %s737_s6 = scalar_lea.hbm %s736_s28, 8  ;;  %s741_s14 = scalar_lea.hbm %s1003_s3, 16 }
  0x38   : > { %p738_p1 = scmp.ne.s32.totalorder %s736_s28, %s737_s6  ;;  %p742_p11 = scmp.lt.s32.totalorder %s736_s28, %s1003_s3 }
  0x39   : > { %p743_p12 = scmp.lt.s32.totalorder %s741_s14, %s737_s6 }
  0x3a   : > { %p739_p4 = pnand %p738_p1, %p916_p5 }
  0x3b   : > { %602 = vrot.lane.b32.xlu0 %v596_v2, %s817_s11  ;;  %612 = vrot.lane.b32.xlu1 %v596_v2, %s818_s19  ;;  %p744_p13 = por %p743_p12, %p742_p11 }
  0x3c   : > { %622 = vrot.lane.b32.xlu2 %v596_v2, %s819_s20  ;;  %p740_p8 = pneg %p739_p4 }
  0x3e   : > { %p745_p0 = pnand %p744_p13, %p740_p8 }
  0x43   : > { %627 = vrot.lane.b32.xlu0 %v596_v2, %s820_s22 }
  0x8e   : > { %v618_v5 = vpop.permute.xlu2 %617 }
  0x8f   : > { %v620_v21 = vunpack.i.h.bf16 %v618_v5  ;;  %v619_v22 = vunpack.i.l.bf16 %v618_v5 }
  0x91   : > { %v291_v30 = vsel %vm290_vm4, %v619_v22, %v620_v21 }
  0x96   : > { %v623_v19 = vpop.permute.xlu2 %622 }
  0x97   : > { %v625_v24 = vunpack.i.h.bf16 %v623_v19  ;;  %v624_v25 = vunpack.i.l.bf16 %v623_v19 }
  0x99   : > { %v284_v31 = vsel %vm283_vm5, %v624_v25, %v625_v24 }
  0xa5   : > { %v598_v6 = vpop.permute.xlu0 %597  ;;  %v608_v7 = vpop.permute.xlu1 %607 }
  0xa6   : > { %v600_v8 = vunpack.i.h.bf16 %v598_v6  ;;  %v599_v9 = vunpack.i.l.bf16 %v598_v6  ;;  %v610_v11 = vunpack.i.h.bf16 %v608_v7  ;;  %v609_v12 = vunpack.i.l.bf16 %v608_v7 }
  0xa8   : > { %v319_v10 = vsel %vm318_vm0, %v599_v9, %v600_v8  ;;  %v305_v23 = vsel %vm304_vm2, %v609_v12, %v610_v11 }
  0xa9   : > { %342 = vmatpush.msra.mxu0 %v319_v10 }
  0xad   : > { %v603_v13 = vpop.permute.xlu0 %602  ;;  %v613_v14 = vpop.permute.xlu1 %612 }
  0xae   : > { %v605_v15 = vunpack.i.h.bf16 %v603_v13  ;;  %v604_v16 = vunpack.i.l.bf16 %v603_v13  ;;  %v615_v17 = vunpack.i.h.bf16 %v613_v14  ;;  %v614_v18 = vunpack.i.l.bf16 %v613_v14 }
  0xb0   : > { %v312_v20 = vsel %vm311_vm1, %v604_v16, %v605_v15  ;;  %v298_v26 = vsel %vm297_vm3, %v614_v18, %v615_v17 }
  0xb1   : > { %343 = vmatpush.msra.mxu0 %v312_v20 }
  0xb3   : > { %344 = vmatpush.msra.mxu0 %v305_v23 }
  0xb5   : > { %345 = vmatpush.msra.mxu0 %v298_v26  ;;  %v628_v27 = vpop.permute.xlu0 %627 }
  0xb6   : > { %v630_v28 = vunpack.i.h.bf16 %v628_v27  ;;  %v629_v29 = vunpack.i.l.bf16 %v628_v27 }
  0xb7   : > { %346 = vmatpush.msra.mxu0 %v291_v30 }
  0xb8   : > { %v277_v32 = vsel %vm276_vm6, %v629_v29, %v630_v28 }
  0xb9   : > { %347 = vmatpush.msra.mxu0 %v284_v31 }
  0xbb   : > { %348 = vmatpush.msra.mxu0 %v277_v32 }
  0xbd   : > { %349 = vmatpush.msra.mxu0 %v267_v0 }
  0xbe   : > { %504 = vmatmul.msk.f32.vlgmr.msra.gmra.mxu0 %vm330_vm7, %v321_v33 }
 0x13b   : > { %v351_v34 = vpop.f32.mrf.mxu0 }
 0x13c   : > { %354 = vst [vmem:[%s265_s27] sm:$0xff] %v351_v34 }
 0x13d   : > { %748 = shalt.err (!%p745_p0)
}
 0x13e   : > { %519 = dma.vmem_to_hbm [thread:$0]  (%p916_p5), %s370_s5, 128, %s372_s29, %s356_s10  }
 0x13f PF: > { %s383_s30 = sand.u32 1, %s791_s12   ;;  %p533_p3 = pnand %p492_p9, %p886_p6 }
 0x140   : > { %s384_s25 = scalar_lea.sflag [#allocation5], %s383_s30 }
 0x141   : > { %p534_p7 = pneg %p533_p3 }
 0x143   : > { %786 = dma.done.wait (%p534_p7), %s384_s25, 128  }
 0x144   : > { %788 = vsyncadd (%p534_p7), %s384_s25, 4294967168  ;;  %s22_s17 = sadd.s32 1, %s811_s17   ;;  %s1018_s7 = sld [smem:[#allocation14_spill]] }
 0x145   : > { %p19_p10 = scmp.ge.s32.totalorder %s22_s17, 4   ;;  %s1019_s14 = sld [smem:[#allocation17_spill]] }
 0x146   : > { %s1020_s15 = sld [smem:[#allocation15_spill]]  ;;  %s1022_s12 = smov %s795_s13 }
 0x147   : > { %s1021_s16 = sld [smem:[#allocation16_spill]]  ;;  %21 = sbr.rel (!%p19_p10) target bundleno = 10 (0xa), region = 94 }
 0x14a   : > { %s1023_s13 = smov %s1018_s7 }
 0x14c   :  { %390 = vsyncpa [#allocation4], 1 }
 0x14d   :  { %392 = vsyncpa [#allocation4 + $0x1], 1 }
 0x14e   :  { %393 = vsyncpa [#allocation7], 1 }
 0x14f   :  { %395 = vsyncpa [#allocation7 + $0x1], 1 }
 0x150   :  { %396 = vsyncpa [#allocation5], 1 }
 0x151   :  { %398 = vsyncpa [#allocation5 + $0x1], 1 }

</bundles_post_ra>
